<compile_context>
chip_gen: v7x
topology: tpu7x:2x2x1
jax: 0.10.0
libtpu: 0.0.40
codegen_flags: <defaults>
</compile_context>

<pallas_src>
import jax
import jax.numpy as jnp
from jax.experimental import pallas as pl
from jax.experimental.pallas import tpu as pltpu

_LANE = 128
_SUBLANE = 8


def _round_up(x, m):
    return (x + m - 1) // m * m


def mlp_kernel(x_ref, w1_ref, b1_ref, w2_ref, b2_ref, o_ref):
    # lin1 + bias + ReLU: bf16 operands on the MXU, f32 accumulate/epilogue.
    h = jnp.dot(x_ref[...], w1_ref[...], preferred_element_type=jnp.float32)
    h = jnp.maximum(h + b1_ref[...], 0.0)          # (1, Hp) bias broadcasts over rows

    # Dropout p=0.5 in eval mode is the identity.
    # TODO(synk): training-mode dropout would use pltpu.prng_seed /
    # pltpu.prng_random_bits (seeded per grid step) to build a keep mask.

    # lin2 + bias: cast hidden back to bf16 so the second matmul is a single
    # bf16 MXU pass; accumulate in f32 and store an f32 tile.
    out = jnp.dot(h.astype(w2_ref.dtype), w2_ref[...],
                  preferred_element_type=jnp.float32)
    o_ref[...] = (out + b2_ref[...]).astype(o_ref.dtype)


def mlp_forward(x, w1, b1, w2, b2, *, tile_n=1024):
    """x: [N, F] float32.  w1: [F, H], b1: [H], w2: [H, C], b2: [C]."""
    N, F = x.shape
    H = w1.shape[1]
    C = w2.shape[1]

    # Pad feature dims to lane (128) multiples for lane-dense vregs and
    # unmasked output stores.
    Fp = _round_up(F, _LANE)
    Hp = _round_up(H, _LANE)
    Cp = _round_up(C, _LANE)

    # Row tiling: big tiles amortize per-grid-step overhead; keep a multiple
    # of 8 (sublane), never larger than the (padded) problem, and keep at
    # least 2 grid steps when possible so v7x's two TensorCores both work.
    tile_n = max(_SUBLANE, min(tile_n, _round_up(N, _SUBLANE)))
    tile_n = _round_up(tile_n, _SUBLANE)
    if N > _SUBLANE and pl.cdiv(N, tile_n) < 2:
        tile_n = _round_up(pl.cdiv(N, 2), _SUBLANE)
    Np = _round_up(N, tile_n)
    grid = (Np // tile_n,)

    # Zero-pad operands.  Zero feature/hidden/class padding is exact: padded
    # hidden columns stay 0 through ReLU, padded output columns stay 0, and
    # padded rows are sliced off below.
    xp = jnp.pad(x.astype(jnp.bfloat16), ((0, Np - N), (0, Fp - F)))
    w1p = jnp.pad(w1.astype(jnp.bfloat16), ((0, Fp - F), (0, Hp - H)))
    b1p = jnp.pad(b1.astype(jnp.float32).reshape(1, H), ((0, 0), (0, Hp - H)))
    w2p = jnp.pad(w2.astype(jnp.bfloat16), ((0, Hp - H), (0, Cp - C)))
    b2p = jnp.pad(b2.astype(jnp.float32).reshape(1, C), ((0, 0), (0, Cp - C)))

    # VMEM budget: double-buffered streaming tiles + resident weights/biases
    # + in-kernel f32 hidden, with headroom; capped at 64 MiB (v7x VMEM).
    bytes_x = 2 * tile_n * Fp * 2          # bf16 x tile, double-buffered
    bytes_o = 2 * tile_n * Cp * 4          # f32 out tile, double-buffered
    bytes_w = 2 * (Fp * Hp * 2 + Hp * Cp * 2 + Hp * 4 + Cp * 4)
    bytes_h = tile_n * Hp * 4              # f32 hidden inside the kernel
    vmem_limit = int(min(max(2 * (bytes_x + bytes_o + bytes_w + bytes_h)
                             + (4 << 20), 16 << 20), 64 << 20))

    out_p = pl.pallas_call(
        mlp_kernel,
        out_shape=jax.ShapeDtypeStruct((Np, Cp), jnp.float32),
        grid_spec=pltpu.PrefetchScalarGridSpec(
            num_scalar_prefetch=0,
            grid=grid,
            in_specs=[
                pl.BlockSpec((tile_n, Fp), lambda i: (i, 0)),   # x row-tile (streamed)
                pl.BlockSpec((Fp, Hp), lambda i: (0, 0)),       # w1 (resident)
                pl.BlockSpec((1, Hp), lambda i: (0, 0)),        # b1 (resident)
                pl.BlockSpec((Hp, Cp), lambda i: (0, 0)),       # w2 (resident)
                pl.BlockSpec((1, Cp), lambda i: (0, 0)),        # b2 (resident)
            ],
            out_specs=pl.BlockSpec((tile_n, Cp), lambda i: (i, 0)),
        ),
        compiler_params=pltpu.CompilerParams(
            dimension_semantics=("parallel",),
            vmem_limit_bytes=vmem_limit,
        ),
    )(xp, w1p, b1p, w2p, b2p)

    # Drop row/column padding.
    return out_p[:N, :C].astype(x.dtype)


if __name__ == "__main__":
    # Small, deterministic problem shaped like Pubmed (500 features, 3 classes)
    # with N chosen to exercise row padding / the cdiv grid.
    N, F, H, C = 200, 500, 32, 3

    key = jax.random.PRNGKey(0)
    kx, kw1, kb1, kw2, kb2 = jax.random.split(key, 5)

    x = jax.random.normal(kx, (N, F), dtype=jnp.float32)

    # PyTorch Linear stores weight as (out, in); we build (in, out) directly.
    lim1 = 1.0 / (F ** 0.5)
    w1 = jax.random.uniform(kw1, (F, H), jnp.float32, -lim1, lim1)
    b1 = jax.random.uniform(kb1, (H,), jnp.float32, -lim1, lim1)
    lim2 = 1.0 / (H ** 0.5)
    w2 = jax.random.uniform(kw2, (H, C), jnp.float32, -lim2, lim2)
    b2 = jax.random.uniform(kb2, (C,), jnp.float32, -lim2, lim2)

    out = mlp_forward(x, w1, b1, w2, b2)
    out = jax.block_until_ready(out)

    # Pure-JAX reference with the same bf16 casts / f32 accumulation the
    # kernel uses (eval-mode dropout == identity).
    x_bf = x.astype(jnp.bfloat16).astype(jnp.float32)
    w1_bf = w1.astype(jnp.bfloat16).astype(jnp.float32)
    w2_bf = w2.astype(jnp.bfloat16).astype(jnp.float32)
    h_ref = jnp.maximum(x_bf @ w1_bf + b1, 0.0)
    ref = h_ref.astype(jnp.bfloat16).astype(jnp.float32) @ w2_bf + b2

    assert out.shape == (N, C)
    assert jnp.allclose(out, ref, atol=2e-3, rtol=2e-3), "mismatch vs reference"

    print("KERNEL_OK")
</pallas_src>

<mosaic_0001>
module attributes {stable_mosaic.version = 11 : i64} {
  func.func @mlp_kernel(%arg0: i32, %arg1: memref<104x512xbf16, #tpu.memory_space<vmem>>, %arg2: memref<512x128xbf16, #tpu.memory_space<vmem>>, %arg3: memref<1x128xf32, #tpu.memory_space<vmem>>, %arg4: memref<128x128xbf16, #tpu.memory_space<vmem>>, %arg5: memref<1x128xf32, #tpu.memory_space<vmem>>, %arg6: memref<104x128xf32, #tpu.memory_space<vmem>>) attributes {dimension_semantics = [#tpu.dimension_semantics<parallel>], iteration_bounds = array<i64: 2>, scalar_prefetch = 0 : i64, scratch_operands = 0 : i64, tpu.core_type = #tpu.core_type<tc>, window_params = [{transform_indices = @transform_0, window_bounds = array<i64: 104, 512>}, {pipeline_mode = #tpu.pipeline_mode<synchronous>, transform_indices = @transform_1, window_bounds = array<i64: 512, 128>}, {pipeline_mode = #tpu.pipeline_mode<synchronous>, transform_indices = @transform_2, window_bounds = array<i64: 1, 128>}, {pipeline_mode = #tpu.pipeline_mode<synchronous>, transform_indices = @transform_3, window_bounds = array<i64: 128, 128>}, {pipeline_mode = #tpu.pipeline_mode<synchronous>, transform_indices = @transform_4, window_bounds = array<i64: 1, 128>}, {transform_indices = @transform_5, window_bounds = array<i64: 104, 128>}]} {
    %c0 = arith.constant 0 : index
    %c0_0 = arith.constant 0 : index
    %0 = vector.load %arg1[%c0, %c0_0] : memref<104x512xbf16, #tpu.memory_space<vmem>>, vector<104x512xbf16>
    %c0_1 = arith.constant 0 : index
    %c0_2 = arith.constant 0 : index
    %1 = vector.load %arg2[%c0_1, %c0_2] : memref<512x128xbf16, #tpu.memory_space<vmem>>, vector<512x128xbf16>
    %cst = arith.constant dense<0.000000e+00> : vector<104x128xf32>
    %2 = tpu.matmul %0, %1, %cst {dimension_numbers = #tpu.dot_dimension_numbers<[1], [0], [0], [1], [0, 0, 1, 1], [], []>} : vector<104x512xbf16>, vector<512x128xbf16>, vector<104x128xf32> -> vector<104x128xf32>
    %c0_3 = arith.constant 0 : index
    %c0_4 = arith.constant 0 : index
    %3 = vector.load %arg3[%c0_3, %c0_4] : memref<1x128xf32, #tpu.memory_space<vmem>>, vector<1x128xf32>
    %4 = vector.broadcast %3 : vector<1x128xf32> to vector<104x128xf32>
    %5 = arith.addf %2, %4 : vector<104x128xf32>
    %cst_5 = arith.constant 0.000000e+00 : f32
    %6 = vector.broadcast %cst_5 : f32 to vector<104x128xf32>
    %7 = arith.maximumf %5, %6 : vector<104x128xf32>
    %8 = arith.truncf %7 : vector<104x128xf32> to vector<104x128xbf16>
    %c0_6 = arith.constant 0 : index
    %c0_7 = arith.constant 0 : index
    %9 = vector.load %arg4[%c0_6, %c0_7] : memref<128x128xbf16, #tpu.memory_space<vmem>>, vector<128x128xbf16>
    %cst_8 = arith.constant dense<0.000000e+00> : vector<104x128xf32>
    %10 = tpu.matmul %8, %9, %cst_8 {dimension_numbers = #tpu.dot_dimension_numbers<[1], [0], [0], [1], [0, 0, 1, 1], [], []>} : vector<104x128xbf16>, vector<128x128xbf16>, vector<104x128xf32> -> vector<104x128xf32>
    %c0_9 = arith.constant 0 : index
    %c0_10 = arith.constant 0 : index
    %11 = vector.load %arg5[%c0_9, %c0_10] : memref<1x128xf32, #tpu.memory_space<vmem>>, vector<1x128xf32>
    %12 = vector.broadcast %11 : vector<1x128xf32> to vector<104x128xf32>
    %13 = arith.addf %10, %12 : vector<104x128xf32>
    %c0_11 = arith.constant 0 : index
    %c0_12 = arith.constant 0 : index
    %14 = vector.load %arg6[%c0_11, %c0_12] : memref<104x128xf32, #tpu.memory_space<vmem>>, vector<104x128xf32>
    tpu.vector_store %arg6[%c0_11, %c0_12], %13 {strides = array<i32>} : memref<104x128xf32, #tpu.memory_space<vmem>>, vector<104x128xf32>,
    return
  }
  func.func @transform_0(%arg0: i32) -> (i32, i32) {
    %c0_i32 = arith.constant 0 : i32
    %c0_i32_0 = arith.constant 0 : i32
    return %arg0, %c0_i32 : i32, i32
  }
  func.func @transform_1(%arg0: i32) -> (i32, i32) {
    %c0_i32 = arith.constant 0 : i32
    %c0_i32_0 = arith.constant 0 : i32
    %c0_i32_1 = arith.constant 0 : i32
    return %c0_i32, %c0_i32_0 : i32, i32
  }
  func.func @transform_2(%arg0: i32) -> (i32, i32) {
    %c0_i32 = arith.constant 0 : i32
    %c0_i32_0 = arith.constant 0 : i32
    %c0_i32_1 = arith.constant 0 : i32
    return %c0_i32, %c0_i32_0 : i32, i32
  }
  func.func @transform_3(%arg0: i32) -> (i32, i32) {
    %c0_i32 = arith.constant 0 : i32
    %c0_i32_0 = arith.constant 0 : i32
    %c0_i32_1 = arith.constant 0 : i32
    return %c0_i32, %c0_i32_0 : i32, i32
  }
  func.func @transform_4(%arg0: i32) -> (i32, i32) {
    %c0_i32 = arith.constant 0 : i32
    %c0_i32_0 = arith.constant 0 : i32
    %c0_i32_1 = arith.constant 0 : i32
    return %c0_i32, %c0_i32_0 : i32, i32
  }
  func.func @transform_5(%arg0: i32) -> (i32, i32) {
    %c0_i32 = arith.constant 0 : i32
    %c0_i32_0 = arith.constant 0 : i32
    return %arg0, %c0_i32 : i32, i32
  }
}

</mosaic_0001>

<bundles_post_ra>
// kernel: tpu_custom_call.1
= control target key start
LH: loop header
LB: loop body
LE: loop exit
PB: predicated region body
PF: predicated region fallthrough
CT: control target
= control target key end

     0   :  { %10 = vsyncpa [#allocation3], 0  ;;  %s2146_s0 = inlined_call_operand.hbm [shape: bf16[208,512], index: 0, kind: input, shape index: {}]   ;;  %s2147_s1 = inlined_call_operand.hbm [shape: bf16[512,128], index: 1, kind: input, shape index: {}]   ;;  %s2148_s2 = inlined_call_operand.vmem [shape: f32[1,128], index: 2, kind: input, shape index: {}]   ;;  %s2149_s3 = inlined_call_operand.hbm [shape: bf16[128,128], index: 3, kind: input, shape index: {}]   ;;  %s2150_s4 = inlined_call_operand.vmem [shape: f32[1,128], index: 4, kind: input, shape index: {}]   ;;  %s2151_s5 = inlined_call_operand.hbm [shape: f32[208,128], index: 5, kind: output, shape index: {}]  }
   0x1   :  { %12 = vsyncpa [#allocation3 + $0x1], 0 }
   0x2   :  { %13 = vsyncpa [#allocation6], 0 }
   0x3   :  { %14 = vsyncpa [#allocation4], 0 }
   0x4   :  { %16 = vsyncpa [#allocation4 + $0x1], 0  ;;  %s1809_s18 = smov 0   ;;  %s1811_s19 = smov 0  }
   0x5   :  { %s1813_s20 = smov 0   ;;  %s1815_s21 = smov 0  }
   0x6 LB: > { %s1830_s22 = sadd.s32 4294967295, %s1765_s21   ;;  %s1173_s23 = sadd.s32 4294967294, %s1765_s21   ;;  %s1765_s21 = sphi %s1815_s21, %s2171_s21   ;;  %s1761_s20 = sphi %s1813_s20, %s2170_s20   ;;  %s1757_s19 = sphi %s1811_s19, %s2169_s19   ;;  %s1753_s18 = sphi %s1809_s18, %s2168_s18  }
   0x7   : > { %p42_p0 = scmp.ne.s32.totalorder %s1757_s19, %s1753_s18  ;;  %p2152_p1 = scmp.eq.s32.totalorder %s1830_s22, 0 }
   0x8   : > { %p156_p3 = scmp.eq.s32.totalorder %s1173_s23, 1  ;;  %p1174_p5 = scmp.ge.s32.totalorder %s1765_s21, 1 }
   0x9   : > { %p1839_p4 = por %p2152_p1, %p42_p0  ;;  %p163_p7 = scmp.lt.s32.totalorder %s1765_s21, 3 }
   0xa   : > { %p1844_p6 = por %p156_p3, %p42_p0  ;;  %s1767_s27 = smov [#allocation5]  }
   0xb   : > { %s2155_s24 = scalar_select %p1839_p4, 1, 0 }
   0xc   : > { %s2156_s25 = scalar_select %p1844_p6, 1, 0 }
   0xd   : > { %p1849_p8 = pnand %p1174_p5, %p163_p7  ;;  %s175_s28 = sshll.u32 %s1767_s27, 4  ;;  %s1853_s28 = int_to_ptr.vmem [resolvable:$true] %s175_s28 }
   0xe   : > { %s1768_s30 = smov [#allocation7]   ;;  %s1609_s9 = scalar_lea.hbm %s2147_s1, 4096 }
   0xf   : > { %p1466_p9 = pneg %p1849_p8  ;;  %s191_s6 = sshll.u32 %s1768_s30, 4  ;;  %s1864_s6 = int_to_ptr.vmem [resolvable:$true] %s191_s6 }
  0x10   : > { %p1610_p12 = scmp.ne.s32.totalorder %s2147_s1, %s1609_s9  ;;  %p1616_p5 = scmp.lt.u32.totalorder %s1609_s9, %s2147_s1 }
  0x11   : > { %p1860_p11 = pnand %p1466_p9, %p2152_p1 }
  0x13   : > { %p1611_p13 = pneg %p1860_p11 }
  0x15   : > { %p1612_p0 = pnand %p1611_p13, %p1610_p12 }
  0x17   : > { %p1613_p3 = pneg %p1612_p0 }
  0x19   : > { %p1618_p7 = pnand %p1616_p5, %p1613_p3 }
  0x1b   : > { %1621 = shalt.err (!%p1618_p7)
}
  0x1c   : > { %s1622_s14 = scalar_lea.vmem %s1853_s28, 4096  ;;  %p1630_p2 = scmp.lt.s32.totalorder %s1853_s28, %s1853_s28 }
  0x1d   : > { %p1623_p9 = scmp.ne.s32.totalorder %s1853_s28, %s1622_s14  ;;  %p1631_p12 = scmp.lt.s32.totalorder %s1622_s14, %s1622_s14 }
  0x1f   : > { %p1625_p10 = pnand %p1623_p9, %p1611_p13  ;;  %p1632_p0 = por %p1631_p12, %p1630_p2 }
  0x21   : > { %p1626_p1 = pneg %p1625_p10 }
  0x23   : > { %p1633_p6 = pnand %p1632_p0, %p1626_p1 }
  0x25   : > { %1636 = shalt.err (!%p1633_p6)
}
  0x26   : > { %s1769_s15 = smov 64   ;;  %s1770_s16 = smov 4  }
  0x27   : > { %1469 = dma.hbm_to_vmem [thread:$0]  (!%p1860_p11), %s2147_s1, 4096, %s1853_s28, [#allocation6], %s1769_s15, %s1769_s15, %s1770_s16  }
  0x28   : > { %s1637_s7 = scalar_lea.hbm %s2149_s3, 1024 }
  0x29   : > { %p1638_p2 = scmp.ne.s32.totalorder %s2149_s3, %s1637_s7  ;;  %p1644_p10 = scmp.lt.u32.totalorder %s1637_s7, %s2149_s3 }
  0x2b   : > { %p1640_p1 = pnand %p1638_p2, %p1611_p13 }
  0x2d   : > { %p1641_p6 = pneg %p1640_p1 }
  0x2f   : > { %p1646_p3 = pnand %p1644_p10, %p1641_p6 }
  0x31   : > { %1649 = shalt.err (!%p1646_p3)
}
  0x32   : > { %s1650_s28 = scalar_lea.vmem %s1864_s6, 1024  ;;  %p1658_p12 = scmp.lt.s32.totalorder %s1864_s6, %s1864_s6 }
  0x33   : > { %p1651_p5 = scmp.ne.s32.totalorder %s1864_s6, %s1650_s28  ;;  %p1659_p0 = scmp.lt.s32.totalorder %s1650_s28, %s1650_s28 }
  0x35   : > { %p1653_p7 = pnand %p1651_p5, %p1611_p13  ;;  %p1660_p2 = por %p1659_p0, %p1658_p12 }
  0x37   : > { %p1654_p9 = pneg %p1653_p7 }
  0x39   : > { %p1661_p1 = pnand %p1660_p2, %p1654_p9 }
  0x3b   : > { %1664 = shalt.err (!%p1661_p1)
}
  0x3c   : > { %1472 = dma.hbm_to_vmem [thread:$0]  (!%p1860_p11), %s2149_s3, 1024, %s1864_s6, [#allocation6], %s1769_s15, %s1769_s15, %s1770_s16  }
  0x3d   : > { %s1919_s14 = sadd.s32 1, %s1765_s21   ;;  %s29_s29 = sadd.s32 1, %s1761_s20 }
  0x3e   : > { %s26_s17 = ssub.s32 %s1765_s21, %s1919_s14  ;;  %p36_p13 = scmp.ne.s32.totalorder %s1761_s20, %s1757_s19 }
  0x3f   : > { %p27_p6 = scmp.eq.s32.totalorder %s26_s17, 0  ;;  %p37_p10 = scmp.eq.s32.totalorder %s1765_s21, 0 }
  0x40   : > { %p2159_p3 = scmp.eq.s32.totalorder %s1830_s22, 1  ;;  %p1483_p7 = scmp.lt.s32.totalorder %s1765_s21, 2 }
  0x41   : > { %s1935_s27 = scalar_select %p27_p6, %s1761_s20, %s29_s29  }
  0x42   : > { %p1929_p5 = por %p2159_p3, %p36_p13  ;;  %p38_p9 = por %p37_p10, %p36_p13 }
  0x43   : > { %s208_s30 = sand.u32 1, %s1761_s20   ;;  %s1259_s6 = smul.u32 3328, %s1765_s21 }
  0x44   : > { %s2160_s23 = scalar_select %p1929_p5, 1, 0 }
  0x45   : > { %s1451_s7 = smul.u32 208, %s208_s30  ;;  %p1939_p11 = pnand %p1483_p7, %p38_p9 }
  0x46   : > { %s1946_s9 = scalar_lea.hbm %s2146_s0, %s1259_s6  ;;  %s1950_s28 = scalar_lea.sflag [#allocation3], %s208_s30 }
  0x47   : > { %s212_s10 = scalar_lea.vmem [#allocation2], %s1451_s7  ;;  %s1665_s12 = scalar_lea.hbm %s1946_s9, 3328 }
  0x48   : > { %s220_s11 = sshll.u32 %s212_s10, 4  ;;  %p1666_p12 = scmp.ne.s32.totalorder %s1946_s9, %s1665_s12  ;;  %s1948_s11 = int_to_ptr.vmem [resolvable:$true] %s220_s11 }
  0x49   : > { %p1667_p0 = pneg %p1939_p11  ;;  %s1670_s17 = scalar_lea.hbm %s2146_s0, 6656 }
  0x4a   : > { %p1671_p13 = scmp.lt.u32.totalorder %s1946_s9, %s2146_s0  ;;  %p1672_p6 = scmp.lt.u32.totalorder %s1670_s17, %s1665_s12 }
  0x4b   : > { %p1668_p2 = pnand %p1667_p0, %p1666_p12  ;;  %p1674_p3 = scmp.lt.u32.totalorder %s1665_s12, %s1946_s9 }
  0x4c   : > { %p1673_p10 = por %p1672_p6, %p1671_p13 }
  0x4d   : > { %p1669_p1 = pneg %p1668_p2 }
  0x4e   : > { %p1675_p7 = por %p1674_p3, %p1673_p10 }
  0x50   : > { %p1676_p9 = pnand %p1675_p7, %p1669_p1 }
  0x52   : > { %1679 = shalt.err (!%p1676_p9)
}
  0x53   : > { %s1680_s30 = scalar_lea.vmem %s1948_s11, 3328  ;;  %s1771_s7 = smov [#allocation2]  }
  0x54   : > { %p1681_p12 = scmp.ne.s32.totalorder %s1948_s11, %s1680_s30  ;;  %s1685_s8 = sshll.u32 %s1771_s7, 4  ;;  %s1686_s8 = int_to_ptr.vmem [resolvable:$false] %s1685_s8 }
  0x55   : > { %s1687_s10 = scalar_lea.vmem %s1686_s8, 6656  ;;  %p1688_p4 = scmp.lt.s32.totalorder %s1948_s11, %s1686_s8 }
  0x56   : > { %p1683_p2 = pnand %p1681_p12, %p1667_p0  ;;  %p1689_p13 = scmp.lt.s32.totalorder %s1687_s10, %s1680_s30 }
  0x58   : > { %p1684_p5 = pneg %p1683_p2  ;;  %p1690_p6 = por %p1689_p13, %p1688_p4 }
  0x5a   : > { %p1691_p10 = pnand %p1690_p6, %p1684_p5 }
  0x5c   : > { %1694 = shalt.err (!%p1691_p10)
}
  0x5d   : > { %s1772_s12 = smov 256   ;;  %s1773_s13 = smov 16  }
  0x5e   : > { %1476 = dma.hbm_to_vmem [thread:$0]  (!%p1939_p11), %s1946_s9, 3328, %s1948_s11, %s1950_s28, %s1772_s12, %s1772_s12, %s1773_s13  }
  0x5f   : > { %232 = sbr.rel (%p1849_p8) target bundleno = 671 (0x29f), region = 40  ;;  %s1981_s29 = sand.u32 (!%p1849_p8), 1, %s1757_s19  }
  0x60   : > { %s1452_s17 = smul.u32 (!%p1849_p8), 208, %s1981_s29  ;;  %s235_s6 = scalar_lea.sflag (!%p1849_p8), [#allocation3], %s1981_s29 }
  0x61   : > { %p2162_p4 = scmp.ne.s32.totalorder (!%p1849_p8), %s2155_s24, 0 }
  0x62   : > { %s1985_s16 = scalar_lea.vmem (!%p1849_p8), [#allocation2], %s1452_s17 }
  0x66   : > { %1740 = dma.done.wait (%p2162_p4), %s235_s6, 3328  }
  0x67   : > { %1742 = vsyncadd (%p2162_p4), %s235_s6, 4294963968  ;;  %p2163_p5 = scmp.eq.s32.totalorder %s1830_s22, 0 }
  0x69   : > { %1744 = dma.done.wait (%p2163_p5), [#allocation6], 5120   ;;  %p2164_p8 = pmov %p2163_p5 }
  0x6a   : > { %v1529_v0 = vld [vmem:[#allocation5 + $0x40] sm:$0xff]   ;;  %v1531_v2 = vld [vmem:[#allocation5 + $0x48] sm:$0xff]   ;;  %v1533_v4 = vld [vmem:[#allocation5 + $0x50] sm:$0xff]   ;;  %v1774_v63 = vmov 0.0   ;;  %vm1775_vm0 = vmmov 0   ;;  %s1453_s15 = smul.u32 104, %s1981_s29 }
  0x6b   : > { %1746 = vsyncadd (%p2164_p8), [#allocation6], 4294962176  ;;  %v1530_v1 = vld [vmem:[#allocation5] sm:$0xff]   ;;  %1435 = vmatprep.subr.bf16.mxu1 %v1529_v0  ;;  %1260 = vmatprep.subr.bf16.mxu0 %v1529_v0  ;;  %v1532_v3 = vld [vmem:[#allocation5 + $0x8] sm:$0xff]   ;;  %s1258_s30 = smul.u32 1664, %s1830_s22  ;;  %s1068_s13 = scalar_lea.sflag [#allocation4], %s1981_s29 }
  0x6c   : > { %1443 = vmatpush3.bf16.msra.mxu1 %v1530_v1  ;;  %1261 = vmatpush3.bf16.msra.mxu0 %v1530_v1  ;;  %v1534_v5 = vld [vmem:[#allocation5 + $0x10] sm:$0xff]   ;;  %v1535_v6 = vld [vmem:[#allocation5 + $0x58] sm:$0xff]   ;;  %v1537_v8 = vld [vmem:[#allocation5 + $0x60] sm:$0xff]   ;;  %s2080_s28 = scalar_lea.vmem [#allocation8], %s1453_s15  ;;  %p2165_p0 = scmp.ne.s32.totalorder %s2160_s23, 0 }
  0x6d   : > { %1436 = vmatprep.subr.bf16.mxu1 %v1531_v2  ;;  %1262 = vmatprep.subr.bf16.mxu0 %v1531_v2  ;;  %v1536_v7 = vld [vmem:[#allocation5 + $0x18] sm:$0xff]   ;;  %v1538_v9 = vld [vmem:[#allocation5 + $0x20] sm:$0xff]   ;;  %v1539_v10 = vld [vmem:[#allocation5 + $0x68] sm:$0xff]   ;;  %s1081_s7 = sshll.u32 %s2080_s28, 4  ;;  %s2099_s12 = scalar_lea.hbm %s2151_s5, %s1258_s30  ;;  %s2101_s7 = int_to_ptr.vmem [resolvable:$true] %s1081_s7 }
  0x6e   : > { %v1547_v11 = vld [vmem:[%s1985_s16 + $0x84] ss:$16 sps:$4 sm:$0xff]   ;;  %v1540_v12 = vld [vmem:[#allocation5 + $0x28] sm:$0xff]   ;;  %v1543_v15 = vld [vmem:[#allocation5 + $0x78] sm:$0xff]   ;;  %s1695_s22 = scalar_lea.vmem %s2101_s7, 1664  ;;  %s1776_s17 = smov [#allocation8]  }
  0x6f   : > { %763 = vmatprep.mubr.bf16.mxu1 %v1547_v11  ;;  %v1541_v13 = vld [vmem:[#allocation5 + $0x70] sm:$0xff]   ;;  %v1544_v16 = vld [vmem:[#allocation5 + $0x38] sm:$0xff]   ;;  %v1548_v17 = vld [vmem:[#allocation5 + $0xc0] sm:$0xff]   ;;  %p1696_p11 = scmp.ne.s32.totalorder %s2101_s7, %s1695_s22  ;;  %s1699_s6 = sshll.u32 %s1776_s17, 4  ;;  %s1700_s6 = int_to_ptr.vmem [resolvable:$false] %s1699_s6 }
  0x70   : > { %1444 = vmatpush3.bf16.msra.mxu1 %v1532_v3  ;;  %1263 = vmatpush3.bf16.msra.mxu0 %v1532_v3  ;;  %v1542_v14 = vld [vmem:[#allocation5 + $0x30] sm:$0xff]   ;;  %v1549_v19 = vld [vmem:[#allocation5 + $0x80] sm:$0xff]   ;;  %v1550_v21 = vld [vmem:[#allocation5 + $0xc8] sm:$0xff]   ;;  %p1702_p7 = scmp.lt.s32.totalorder %s2101_s7, %s1700_s6 }
  0x71   : > { %1437 = vmatprep.subr.bf16.mxu1 %v1533_v4  ;;  %1264 = vmatprep.subr.bf16.mxu0 %v1533_v4  ;;  %v1545_v18 = vld [vmem:[%s1985_s16 + $0x80] ss:$16 sps:$4 sm:$0xff]   ;;  %v1554_v20 = vld [vmem:[%s1985_s16 + $0xa4] ss:$16 sps:$4 sm:$0xff]   ;;  %v1551_v22 = vld [vmem:[#allocation5 + $0x88] sm:$0xff]   ;;  %p1697_p1 = pnand %p1696_p11, %p2165_p0 }
  0x72   : > { %v1567_v23 = vld [vmem:[%s1985_s16] ss:$16 sps:$4 sm:$0xff]   ;;  %v1569_v24 = vld [vmem:[%s1985_s16 + $0x4] ss:$16 sps:$4 sm:$0xff]   ;;  %v1556_v31 = vld [vmem:[#allocation5 + $0xd8] sm:$0xff]  }
  0x73   : > { %v1552_v25 = vld [vmem:[#allocation5 + $0xd0] sm:$0xff]   ;;  %731 = vmatprep.mubr.bf16.mxu0 %v1569_v24  ;;  %v1558_v34 = vld [vmem:[#allocation5 + $0x98] sm:$0xff]   ;;  %v1559_v35 = vld [vmem:[#allocation5 + $0xe0] sm:$0xff]   ;;  %p1698_p3 = pneg %p1697_p1 }
  0x74   : > { %1445 = vmatpush3.bf16.msra.mxu1 %v1534_v5  ;;  %1265 = vmatpush3.bf16.msra.mxu0 %v1534_v5  ;;  %v300_v26 = vld [vmem:[%s1985_s16 + $0xc0] sm:$0xff]  ;;  %v1562_v37 = vld [vmem:[#allocation5 + $0xe8] sm:$0xff]   ;;  %v1570_v45 = vld [vmem:[#allocation5 + $0xf8] sm:$0xff]  }
  0x75   : > { %1438 = vmatprep.subr.bf16.mxu1 %v1535_v6  ;;  %1266 = vmatprep.subr.bf16.mxu0 %v1535_v6  ;;  %v1557_v27 = vld [vmem:[%s1985_s16 + $0xa0] ss:$16 sps:$4 sm:$0xff]   ;;  %v1575_v28 = vld [vmem:[%s1985_s16 + $0x24] ss:$16 sps:$4 sm:$0xff]   ;;  %v1209_v30 = vcombine.high %v300_v26, %v300_v26  ;;  %v1208_v38 = vcombine.low %v300_v26, %v300_v26  ;;  %v1574_v39 = vld [vmem:[%s1985_s16 + $0xc] ss:$16 sps:$4 sm:$0xff]  }
  0x76   : > { %v1553_v29 = vld [vmem:[#allocation5 + $0x90] sm:$0xff]   ;;  %v1560_v36 = vld [vmem:[#allocation5 + $0xa0] sm:$0xff]   ;;  %v1564_v42 = vld [vmem:[#allocation5 + $0xa8] sm:$0xff]  }
  0x77   : > { %v1577_v32 = vld [vmem:[%s1985_s16 + $0x20] ss:$16 sps:$4 sm:$0xff]   ;;  %v1581_v33 = vld [vmem:[%s1985_s16 + $0x44] ss:$16 sps:$4 sm:$0xff]   ;;  %v1571_v47 = vld [vmem:[#allocation5 + $0xb8] sm:$0xff]  }
  0x78   : > { %1446 = vmatpush3.bf16.msra.mxu1 %v1536_v7  ;;  %1267 = vmatpush3.bf16.msra.mxu0 %v1536_v7  ;;  %v1583_v40 = vld [vmem:[%s1985_s16 + $0x40] ss:$16 sps:$4 sm:$0xff]   ;;  %v1587_v41 = vld [vmem:[%s1985_s16 + $0x64] ss:$16 sps:$4 sm:$0xff]   ;;  %v1572_v48 = vld [vmem:[%s1985_s16 + $0x8] ss:$16 sps:$4 sm:$0xff]  }
  0x79   : > { %1439 = vmatprep.subr.bf16.mxu1 %v1537_v8  ;;  %1268 = vmatprep.subr.bf16.mxu0 %v1537_v8  ;;  %v1565_v43 = vld [vmem:[#allocation5 + $0xf0] sm:$0xff]   ;;  %v1578_v49 = vld [vmem:[%s1985_s16 + $0x2c] ss:$16 sps:$4 sm:$0xff]   ;;  %v1580_v50 = vld [vmem:[%s1985_s16 + $0x28] ss:$16 sps:$4 sm:$0xff]  }
  0x7a   : > { %v1566_v44 = vld [vmem:[#allocation5 + $0xb0] sm:$0xff]   ;;  %v1584_v51 = vld [vmem:[%s1985_s16 + $0x4c] ss:$16 sps:$4 sm:$0xff]   ;;  %v1586_v52 = vld [vmem:[%s1985_s16 + $0x48] ss:$16 sps:$4 sm:$0xff]  }
  0x7b   : > { %v1589_v46 = vld [vmem:[%s1985_s16 + $0x60] ss:$16 sps:$4 sm:$0xff]   ;;  %v1590_v53 = vld [vmem:[%s1985_s16 + $0x6c] ss:$16 sps:$4 sm:$0xff]   ;;  %v1592_v54 = vld [vmem:[%s1985_s16 + $0x68] ss:$16 sps:$4 sm:$0xff]  }
  0x7c   : > { %1447 = vmatpush3.bf16.msra.mxu1 %v1538_v9  ;;  %1269 = vmatpush3.bf16.msra.mxu0 %v1538_v9  ;;  %v1593_v55 = vld [vmem:[%s1985_s16 + $0x8c] ss:$16 sps:$4 sm:$0xff]   ;;  %v1595_v56 = vld [vmem:[%s1985_s16 + $0x88] ss:$16 sps:$4 sm:$0xff]   ;;  %v1601_v62 = vld [vmem:[#allocation7] sm:$0xff]  }
  0x7d   : > { %1440 = vmatprep.subr.bf16.mxu1 %v1539_v10  ;;  %1270 = vmatprep.subr.bf16.mxu0 %v1539_v10  ;;  %v1596_v57 = vld [vmem:[%s1985_s16 + $0xac] ss:$16 sps:$4 sm:$0xff]   ;;  %v1598_v59 = vld [vmem:[%s1985_s16 + $0xa8] ss:$16 sps:$4 sm:$0xff]   ;;  %v1603_v1 = vld [vmem:[#allocation7 + $0x10] sm:$0xff]  }
  0x7e   : > { %v301_v58 = vld [vmem:[%s1985_s16 + $0xc8] sm:$0xff]  ;;  %v1605_v3 = vld [vmem:[#allocation7 + $0x20] sm:$0xff]   ;;  %v1607_v5 = vld [vmem:[#allocation7 + $0x30] sm:$0xff]   ;;  %s1701_s16 = scalar_lea.vmem %s1700_s6, 3328 }
  0x7f   : > { %v1211_v60 = vcombine.high %v301_v58, %v301_v58  ;;  %v1210_v61 = vcombine.low %v301_v58, %v301_v58  ;;  %v1602_v0 = vld [vmem:[#allocation7 + $0x8] sm:$0xff]   ;;  %v1604_v2 = vld [vmem:[#allocation7 + $0x18] sm:$0xff]   ;;  %p1703_p9 = scmp.lt.s32.totalorder %s1701_s16, %s1695_s22 }
  0x80   : > { %1448 = vmatpush3.bf16.msra.mxu1 %v1540_v12  ;;  %1271 = vmatpush3.bf16.msra.mxu0 %v1540_v12  ;;  %v1606_v4 = vld [vmem:[#allocation7 + $0x28] sm:$0xff]   ;;  %v1608_v6 = vld [vmem:[#allocation7 + $0x38] sm:$0xff]  }
  0x81   : > { %1441 = vmatprep.subr.bf16.mxu1 %v1541_v13  ;;  %1272 = vmatprep.subr.bf16.mxu0 %v1541_v13  ;;  %p1704_p12 = por %p1703_p9, %p1702_p7 }
  0x83   : > { %p1705_p2 = pnand %p1704_p12, %p1698_p3 }
  0x84   : > { %1449 = vmatpush3.bf16.msra.mxu1 %v1542_v14  ;;  %1273 = vmatpush3.bf16.msra.mxu0 %v1542_v14 }
  0x85   : > { %1442 = vmatprep.subr.bf16.mxu1 %v1543_v15  ;;  %1274 = vmatprep.subr.bf16.mxu0 %v1543_v15 }
  0x88   : > { %1450 = vmatpush3.bf16.msra.mxu1 %v1544_v16  ;;  %1275 = vmatpush3.bf16.msra.mxu0 %v1544_v16 }
  0x89   : > { %1318 = vmatprep.subr.bf16.mxu1 %v1548_v17  ;;  %1391 = vmatprep.subr.bf16.mxu0 %v1774_v63 }
  0x8b   : > { %764 = vmatmul.mubr.bf16.vlgmr.msra.gmra.mrb[0].mxu1 %v1545_v18  ;;  %732 = vmatmul.mubr.bf16.vlgmr.msra.gmra.mrb[0].mxu0 %v1567_v23 }
  0x8c   : > { %1319 = vmatpush3.bf16.msra.mxu1 %v1549_v19  ;;  %771 = vmatprep.mubr.bf16.mxu1 %v1554_v20 }
  0x8d   : > { %1320 = vmatprep.subr.bf16.mxu1 %v1550_v21  ;;  %739 = vmatprep.mubr.bf16.mxu0 %v1575_v28 }
  0x8e   : > { %1392 = vmatpush3.bf16.msra.mxu0 %v1601_v62 }
  0x8f   : > { %1393 = vmatprep.subr.bf16.mxu0 %v1774_v63 }
  0x90   : > { %1321 = vmatpush3.bf16.msra.mxu1 %v1551_v22 }
  0x91   : > { %1322 = vmatprep.subr.bf16.mxu1 %v1552_v25 }
  0x92   : > { %1394 = vmatpush3.bf16.msra.mxu0 %v1602_v0 }
  0x93   : > { %772 = vmatmul.mubr.bf16.gmra.mrb[4].mxu1 %v1557_v27  ;;  %740 = vmatmul.mubr.bf16.gmra.mrb[4].mxu0 %v1577_v32 }
  0x94   : > { %1323 = vmatpush3.bf16.msra.mxu1 %v1553_v29  ;;  %779 = vmatprep.mubr.bf16.mxu1 %v1209_v30 }
  0x95   : > { %1324 = vmatprep.subr.bf16.mxu1 %v1556_v31  ;;  %747 = vmatprep.mubr.bf16.mxu0 %v1581_v33 }
  0x96   : > { %1395 = vmatprep.subr.bf16.mxu0 %v1774_v63 }
  0x97   : > { %1396 = vmatpush3.bf16.msra.mxu0 %v1603_v1 }
  0x98   : > { %1325 = vmatpush3.bf16.msra.mxu1 %v1558_v34  ;;  %1397 = vmatprep.subr.bf16.mxu0 %v1774_v63 }
  0x99   : > { %1326 = vmatprep.subr.bf16.mxu1 %v1559_v35 }
  0x9b   : > { %780 = vmatmul.mubr.bf16.gmra.mrb[8].mxu1 %v1208_v38  ;;  %748 = vmatmul.mubr.bf16.gmra.mrb[8].mxu0 %v1583_v40 }
  0x9c   : > { %1327 = vmatpush3.bf16.msra.mxu1 %v1560_v36  ;;  %819 = vmatprep.mubr.bf16.mxu1 %v1574_v39 }
  0x9d   : > { %1328 = vmatprep.subr.bf16.mxu1 %v1562_v37  ;;  %755 = vmatprep.mubr.bf16.mxu0 %v1587_v41 }
  0x9e   : > { %1398 = vmatpush3.bf16.msra.mxu0 %v1604_v2 }
  0x9f   : > { %1399 = vmatprep.subr.bf16.mxu0 %v1774_v63 }
  0xa0   : > { %1329 = vmatpush3.bf16.msra.mxu1 %v1564_v42 }
  0xa1   : > { %1330 = vmatprep.subr.bf16.mxu1 %v1565_v43 }
  0xa2   : > { %1400 = vmatpush3.bf16.msra.mxu0 %v1605_v3 }
  0xa3   : > { %756 = vmatmul.mubr.bf16.gmra.mrb[12].mxu0 %v1589_v46  ;;  %1401 = vmatprep.subr.bf16.mxu0 %v1774_v63 }
  0xa4   : > { %1331 = vmatpush3.bf16.msra.mxu1 %v1566_v44  ;;  %1407 = vmatprep.mubr.msk.bf16.mxu0 %vm1775_vm0, %v1774_v63 }
  0xa5   : > { %1332 = vmatprep.subr.bf16.mxu1 %v1570_v45 }
  0xa6   : > { %1402 = vmatpush3.bf16.msra.mxu0 %v1606_v4 }
  0xa7   : > { %1403 = vmatprep.subr.bf16.mxu0 %v1774_v63 }
  0xa8   : > { %1333 = vmatpush3.bf16.msra.mxu1 %v1571_v47  ;;  %v2044_v47 = vld [vmem:[%s2148_s2] ss:$0 sm:$0xff] }
  0xaa   : > { %1404 = vmatpush3.bf16.msra.mxu0 %v1607_v5 }
  0xab   : > { %820 = vmatmul.mubr.bf16.vlgmr.msra.gmra.mrb[12].mxu1 %v1572_v48  ;;  %1405 = vmatprep.subr.bf16.mxu0 %v1774_v63 }
  0xac   : > { %827 = vmatprep.mubr.bf16.mxu1 %v1578_v49 }
  0xae   : > { %1406 = vmatpush3.bf16.msra.mxu0 %v1608_v6 }
  0xb3   : > { %828 = vmatmul.mubr.bf16.gmra.mrb[16].mxu1 %v1580_v50 }
  0xb4   : > { %835 = vmatprep.mubr.bf16.mxu1 %v1584_v51 }
  0xbb   : > { %836 = vmatmul.mubr.bf16.gmra.mrb[20].mxu1 %v1586_v52 }
  0xbc   : > { %843 = vmatprep.mubr.bf16.mxu1 %v1590_v53 }
  0xc3   : > { %844 = vmatmul.mubr.bf16.gmra.mrb[24].mxu1 %v1592_v54 }
  0xc4   : > { %851 = vmatprep.mubr.bf16.mxu1 %v1593_v55 }
  0xcb   : > { %852 = vmatmul.mubr.bf16.gmra.mrb[28].mxu1 %v1595_v56 }
  0xcc   : > { %859 = vmatprep.mubr.bf16.mxu1 %v1596_v57 }
  0xd3   : > { %860 = vmatmul.mubr.bf16.gmra.mrb[32].mxu1 %v1598_v59 }
  0xd4   : > { %867 = vmatprep.mubr.bf16.mxu1 %v1211_v60 }
  0xdb   : > { %868 = vmatmul.mubr.bf16.gmra.mrb[36].mxu1 %v1210_v61 }
 0x15e   : > { %v1300_v7 = vpop.f32.mrb[0].mxu1  ;;  %v1276_v12 = vpop.f32.mrb[0].mxu0 }
 0x15f   : > { %v1301_v8 = vpop.f32.mrb[1].mxu1  ;;  %v1277_v14 = vpop.f32.mrb[1].mxu0 }
 0x160   : > { %v2031_v9 = vadd.f32 %v1301_v8, %v1300_v7  ;;  %v1303_v10 = vpop.f32.mrb[2].mxu1  ;;  %v1278_v15 = vadd.f32 %v1277_v14, %v1276_v12  ;;  %v1279_v16 = vpop.f32.mrb[2].mxu0 }
 0x161   : > { %v1304_v11 = vpop.f32.mrb[3].mxu1  ;;  %v1280_v17 = vpop.f32.mrb[3].mxu0 }
 0x162   : > { %v2033_v13 = vadd.f32 %v1304_v11, %v1303_v10  ;;  %v1281_v18 = vadd.f32 %v1280_v17, %v1279_v16  ;;  %v734_v49 = vadd.f32 %v1278_v15, %v2044_v47 }
 0x164   : > { %v737_v55 = vadd.f32 %v1281_v18, %v2044_v47 }
 0x166   : > { %v1306_v19 = vpop.f32.mrb[4].mxu1  ;;  %v1282_v24 = vpop.f32.mrb[4].mxu0 }
 0x167   : > { %v1307_v20 = vpop.f32.mrb[5].mxu1  ;;  %v1283_v26 = vpop.f32.mrb[5].mxu0 }
 0x168   : > { %v2035_v21 = vadd.f32 %v1307_v20, %v1306_v19  ;;  %v1309_v22 = vpop.f32.mrb[6].mxu1  ;;  %v1284_v27 = vadd.f32 %v1283_v26, %v1282_v24  ;;  %v1285_v28 = vpop.f32.mrb[6].mxu0 }
 0x169   : > { %v1310_v23 = vpop.f32.mrb[7].mxu1  ;;  %v1286_v29 = vpop.f32.mrb[7].mxu0 }
 0x16a   : > { %v2037_v25 = vadd.f32 %v1310_v23, %v1309_v22  ;;  %v1287_v30 = vadd.f32 %v1286_v29, %v1285_v28  ;;  %v742_v61 = vadd.f32 %v1284_v27, %v2044_v47 }
 0x16c   : > { %v745_v5 = vadd.f32 %v1287_v30, %v2044_v47 }
 0x16e   : > { %v1312_v31 = vpop.f32.mrb[8].mxu1  ;;  %v1288_v36 = vpop.f32.mrb[8].mxu0 }
 0x16f   : > { %v1313_v32 = vpop.f32.mrb[9].mxu1  ;;  %v1289_v37 = vpop.f32.mrb[9].mxu0 }
 0x170   : > { %v2039_v33 = vadd.f32 %v1313_v32, %v1312_v31  ;;  %v1315_v34 = vpop.f32.mrb[10].mxu1  ;;  %v1290_v38 = vadd.f32 %v1289_v37, %v1288_v36  ;;  %v1291_v39 = vpop.f32.mrb[10].mxu0 }
 0x171   : > { %v1316_v35 = vpop.f32.mrb[11].mxu1  ;;  %v1292_v40 = vpop.f32.mrb[11].mxu0 }
 0x172   : > { %v1293_v41 = vadd.f32 %v1292_v40, %v1291_v39  ;;  %v750_v12 = vadd.f32 %v1290_v38, %v2044_v47 }
 0x174   : > { %v753_v20 = vadd.f32 %v1293_v41, %v2044_v47 }
 0x176   : > { %v1294_v42 = vpop.f32.mrb[12].mxu0 }
 0x177   : > { %v1295_v43 = vpop.f32.mrb[13].mxu0 }
 0x178   : > { %v1296_v44 = vadd.f32 %v1295_v43, %v1294_v42  ;;  %v1297_v45 = vpop.f32.mrb[14].mxu0 }
 0x179   : > { %v1298_v46 = vpop.f32.mrb[15].mxu0 }
 0x17a   : > { %v1299_v48 = vadd.f32 %v1298_v46, %v1297_v45  ;;  %v758_v28 = vadd.f32 %v1296_v44, %v2044_v47  ;;  %v766_v44 = vadd.f32 %v2031_v9, %v2044_v47  ;;  %v774_v9 = vadd.f32 %v2035_v21, %v2044_v47 }
 0x17b   : > { %v782_v21 = vadd.f32 %v2039_v33, %v2044_v47 }
 0x17c   : > { %v761_v36 = vadd.f32 %v1299_v48, %v2044_v47  ;;  %v769_v48 = vadd.f32 %v2033_v13, %v2044_v47  ;;  %v777_v13 = vadd.f32 %v2037_v25, %v2044_v47 }
 0x17e   : > { %v1334_v50 = vpop.f32.mrb[12].mxu1 }
 0x17f   : > { %v1335_v51 = vpop.f32.mrb[13].mxu1 }
 0x180   : > { %v1336_v52 = vadd.f32 %v1335_v51, %v1334_v50  ;;  %v1337_v53 = vpop.f32.mrb[14].mxu1 }
 0x181   : > { %v1338_v54 = vpop.f32.mrb[15].mxu1 }
 0x182   : > { %v822_v56 = vadd.f32 %v1336_v52, %v734_v49  ;;  %v1339_v57 = vadd.f32 %v1338_v54, %v1337_v53 }
 0x184   : > { %v825_v58 = vadd.f32 %v1339_v57, %v737_v55  ;;  %v875_v59 = vmax.f32 %v822_v56, 0.0 }
 0x186   : > { %v876_v60 = vmax.f32 %v825_v58, 0.0  ;;  %v1340_v62 = vpop.f32.mrb[16].mxu1 }
 0x187   : > { %v1341_v0 = vpop.f32.mrb[17].mxu1 }
 0x188   : > { %v888_v1 = vpack.c.bf16 %v876_v60, %v875_v59  ;;  %v1342_v2 = vadd.f32 %v1341_v0, %v1340_v62  ;;  %v1343_v3 = vpop.f32.mrb[18].mxu1 }
 0x189   : > { %v1344_v4 = vpop.f32.mrb[19].mxu1 }
 0x18a   : > { %v830_v6 = vadd.f32 %v1342_v2, %v742_v61  ;;  %v1345_v7 = vadd.f32 %v1344_v4, %v1343_v3  ;;  %1408 = vmatmul.mubr.bf16.vlgmr.msra.gmra.mrb[16].mxu0 %v888_v1 }
 0x18b   : > { %1411 = vmatprep.mubr.msk.bf16.mxu0 %vm1775_vm0, %v1774_v63 }
 0x18c   : > { %v833_v8 = vadd.f32 %v1345_v7, %v745_v5  ;;  %v877_v10 = vmax.f32 %v830_v6, 0.0 }
 0x18e   : > { %v878_v11 = vmax.f32 %v833_v8, 0.0  ;;  %v1346_v14 = vpop.f32.mrb[20].mxu1 }
 0x18f   : > { %v1347_v15 = vpop.f32.mrb[21].mxu1 }
 0x190   : > { %v1348_v16 = vadd.f32 %v1347_v15, %v1346_v14  ;;  %v1349_v17 = vpop.f32.mrb[22].mxu1  ;;  %v889_v18 = vpack.c.bf16 %v878_v11, %v877_v10  ;;  %v1244_v14 = vld [vmem:[%s2150_s4] ss:$0 sm:$0xff] }
 0x191   : > { %v1350_v19 = vpop.f32.mrb[23].mxu1 }
 0x192   : > { %v838_v22 = vadd.f32 %v1348_v16, %v750_v12  ;;  %v1351_v23 = vadd.f32 %v1350_v19, %v1349_v17  ;;  %1412 = vmatmul.mubr.bf16.gmra.mrb[20].mxu0 %v889_v18 }
 0x193   : > { %1415 = vmatprep.mubr.msk.bf16.mxu0 %vm1775_vm0, %v1774_v63 }
 0x194   : > { %v841_v24 = vadd.f32 %v1351_v23, %v753_v20  ;;  %v879_v26 = vmax.f32 %v838_v22, 0.0 }
 0x196   : > { %v880_v27 = vmax.f32 %v841_v24, 0.0  ;;  %v1352_v29 = vpop.f32.mrb[24].mxu1 }
 0x197   : > { %v1353_v30 = vpop.f32.mrb[25].mxu1 }
 0x198   : > { %v1354_v31 = vadd.f32 %v1353_v30, %v1352_v29  ;;  %v1355_v32 = vpop.f32.mrb[26].mxu1  ;;  %v890_v34 = vpack.c.bf16 %v880_v27, %v879_v26 }
 0x199   : > { %v1356_v35 = vpop.f32.mrb[27].mxu1 }
 0x19a   : > { %v846_v37 = vadd.f32 %v1354_v31, %v758_v28  ;;  %v1357_v38 = vadd.f32 %v1356_v35, %v1355_v32  ;;  %1416 = vmatmul.mubr.bf16.gmra.mrb[24].mxu0 %v890_v34 }
 0x19b   : > { %1419 = vmatprep.mubr.msk.bf16.mxu0 %vm1775_vm0, %v1774_v63 }
 0x19c   : > { %v849_v39 = vadd.f32 %v1357_v38, %v761_v36  ;;  %v881_v40 = vmax.f32 %v846_v37, 0.0 }
 0x19e   : > { %v882_v41 = vmax.f32 %v849_v39, 0.0  ;;  %v1358_v42 = vpop.f32.mrb[28].mxu1 }
 0x19f   : > { %v1359_v43 = vpop.f32.mrb[29].mxu1 }
 0x1a0   : > { %v1360_v45 = vadd.f32 %v1359_v43, %v1358_v42  ;;  %v1361_v46 = vpop.f32.mrb[30].mxu1  ;;  %v891_v49 = vpack.c.bf16 %v882_v41, %v881_v40 }
 0x1a1   : > { %v1362_v50 = vpop.f32.mrb[31].mxu1 }
 0x1a2   : > { %v854_v51 = vadd.f32 %v1360_v45, %v766_v44  ;;  %v1363_v52 = vadd.f32 %v1362_v50, %v1361_v46  ;;  %1420 = vmatmul.mubr.bf16.gmra.mrb[28].mxu0 %v891_v49 }
 0x1a3   : > { %1423 = vmatprep.mubr.msk.bf16.mxu0 %vm1775_vm0, %v1774_v63 }
 0x1a4   : > { %v857_v53 = vadd.f32 %v1363_v52, %v769_v48  ;;  %v883_v54 = vmax.f32 %v854_v51, 0.0 }
 0x1a6   : > { %v884_v55 = vmax.f32 %v857_v53, 0.0  ;;  %v1364_v56 = vpop.f32.mrb[32].mxu1 }
 0x1a7   : > { %v1365_v57 = vpop.f32.mrb[33].mxu1 }
 0x1a8   : > { %v1366_v58 = vadd.f32 %v1365_v57, %v1364_v56  ;;  %v1367_v59 = vpop.f32.mrb[34].mxu1  ;;  %v892_v60 = vpack.c.bf16 %v884_v55, %v883_v54 }
 0x1a9   : > { %v1368_v61 = vpop.f32.mrb[35].mxu1 }
 0x1aa   : > { %v862_v62 = vadd.f32 %v1366_v58, %v774_v9  ;;  %v1369_v0 = vadd.f32 %v1368_v61, %v1367_v59  ;;  %1424 = vmatmul.mubr.bf16.gmra.mrb[32].mxu0 %v892_v60 }
 0x1ab   : > { %1427 = vmatprep.mubr.msk.bf16.mxu0 %vm1775_vm0, %v1774_v63 }
 0x1ac   : > { %v865_v1 = vadd.f32 %v1369_v0, %v777_v13  ;;  %v885_v2 = vmax.f32 %v862_v62, 0.0 }
 0x1ae   : > { %v886_v3 = vmax.f32 %v865_v1, 0.0  ;;  %v1370_v4 = vpop.f32.mrb[36].mxu1 }
 0x1af   : > { %v1371_v5 = vpop.f32.mrb[37].mxu1 }
 0x1b0   : > { %v1372_v6 = vadd.f32 %v1371_v5, %v1370_v4  ;;  %v1373_v7 = vpop.f32.mrb[38].mxu1  ;;  %v893_v8 = vpack.c.bf16 %v886_v3, %v885_v2 }
 0x1b1   : > { %v1374_v10 = vpop.f32.mrb[39].mxu1 }
 0x1b2   : > { %v870_v25 = vadd.f32 %v1372_v6, %v782_v21  ;;  %1428 = vmatmul.mubr.bf16.gmra.mrb[36].mxu0 %v893_v8 }
 0x1b3   : > { %1431 = vmatprep.mubr.msk.bf16.mxu0 %vm1775_vm0, %v1774_v63 }
 0x1b4   : > { %v887_v11 = vmax.f32 %v870_v25, 0.0 }
 0x1b6   : > { %v894_v12 = vpack.c.bf16 %v887_v11, %v887_v11 }
 0x1ba   : > { %1432 = vmatmul.mubr.bf16.gmra.mrb[40].mxu0 %v894_v12 }
 0x25d   : > { %v1000_v15 = vpop.f32.mrb[16].mxu0 }
 0x25e   : > { %v1001_v16 = vadd.f32 %v1244_v14, %v1000_v15  ;;  %v1409_v33 = vpop.f32.mrb[17].mxu0 }
 0x25f   : > { %v1003_v47 = vpop.f32.mrb[18].mxu0 }
 0x260   : > { %1054 = vst [vmem:[%s2080_s28] sm:$0xff] %v1001_v16  ;;  %v1004_v63 = vadd.f32 %v1244_v14, %v1003_v47  ;;  %v1410_v17 = vpop.f32.mrb[19].mxu0 }
 0x262   : > { %1055 = vst [vmem:[%s2080_s28 + $0x8] sm:$0xff] %v1004_v63 }
 0x265   : > { %v1008_v18 = vpop.f32.mrb[20].mxu0 }
 0x266   : > { %v1009_v19 = vadd.f32 %v1244_v14, %v1008_v18  ;;  %v1413_v20 = vpop.f32.mrb[21].mxu0 }
 0x267   : > { %v1011_v22 = vpop.f32.mrb[22].mxu0 }
 0x268   : > { %1056 = vst [vmem:[%s2080_s28 + $0x10] sm:$0xff] %v1009_v19  ;;  %v1012_v23 = vadd.f32 %v1244_v14, %v1011_v22  ;;  %v1414_v24 = vpop.f32.mrb[23].mxu0 }
 0x26a   : > { %1057 = vst [vmem:[%s2080_s28 + $0x18] sm:$0xff] %v1012_v23 }
 0x26d   : > { %v1016_v26 = vpop.f32.mrb[24].mxu0 }
 0x26e   : > { %v1017_v27 = vadd.f32 %v1244_v14, %v1016_v26  ;;  %v1417_v28 = vpop.f32.mrb[25].mxu0 }
 0x26f   : > { %v1019_v29 = vpop.f32.mrb[26].mxu0 }
 0x270   : > { %1058 = vst [vmem:[%s2080_s28 + $0x20] sm:$0xff] %v1017_v27  ;;  %v1020_v30 = vadd.f32 %v1244_v14, %v1019_v29  ;;  %v1418_v31 = vpop.f32.mrb[27].mxu0 }
 0x272   : > { %1059 = vst [vmem:[%s2080_s28 + $0x28] sm:$0xff] %v1020_v30 }
 0x275   : > { %v1024_v32 = vpop.f32.mrb[28].mxu0 }
 0x276   : > { %v1025_v34 = vadd.f32 %v1244_v14, %v1024_v32  ;;  %v1421_v35 = vpop.f32.mrb[29].mxu0 }
 0x277   : > { %v1027_v36 = vpop.f32.mrb[30].mxu0 }
 0x278   : > { %1060 = vst [vmem:[%s2080_s28 + $0x30] sm:$0xff] %v1025_v34  ;;  %v1028_v37 = vadd.f32 %v1244_v14, %v1027_v36  ;;  %v1422_v38 = vpop.f32.mrb[31].mxu0 }
 0x27a   : > { %1061 = vst [vmem:[%s2080_s28 + $0x38] sm:$0xff] %v1028_v37 }
 0x27d   : > { %v1032_v39 = vpop.f32.mrb[32].mxu0 }
 0x27e   : > { %v1033_v40 = vadd.f32 %v1244_v14, %v1032_v39  ;;  %v1425_v41 = vpop.f32.mrb[33].mxu0 }
 0x27f   : > { %v1035_v42 = vpop.f32.mrb[34].mxu0 }
 0x280   : > { %1062 = vst [vmem:[%s2080_s28 + $0x40] sm:$0xff] %v1033_v40  ;;  %v1036_v43 = vadd.f32 %v1244_v14, %v1035_v42  ;;  %v1426_v44 = vpop.f32.mrb[35].mxu0 }
 0x282   : > { %1063 = vst [vmem:[%s2080_s28 + $0x48] sm:$0xff] %v1036_v43 }
 0x285   : > { %v1040_v45 = vpop.f32.mrb[36].mxu0 }
 0x286   : > { %v1041_v46 = vadd.f32 %v1244_v14, %v1040_v45  ;;  %v1429_v49 = vpop.f32.mrb[37].mxu0 }
 0x287   : > { %v1043_v50 = vpop.f32.mrb[38].mxu0 }
 0x288   : > { %1064 = vst [vmem:[%s2080_s28 + $0x50] sm:$0xff] %v1041_v46  ;;  %v1044_v48 = vadd.f32 %v1244_v14, %v1043_v50  ;;  %v1430_v51 = vpop.f32.mrb[39].mxu0 }
 0x28a   : > { %1065 = vst [vmem:[%s2080_s28 + $0x58] sm:$0xff] %v1044_v48 }
 0x28d   : > { %v1048_v52 = vpop.f32.mrb[40].mxu0 }
 0x28e   : > { %v1049_v53 = vadd.f32 %v1244_v14, %v1048_v52  ;;  %v1433_v54 = vpop.f32.mrb[41].mxu0 }
 0x28f   : > { %v1051_v55 = vpop.f32.mrb[42].mxu0 }
 0x290   : > { %1066 = vst [vmem:[%s2080_s28 + $0x60] sm:$0xff] %v1049_v53  ;;  %v1434_v56 = vpop.f32.mrb[43].mxu0 }
 0x291   : > { %1708 = shalt.err (!%p1705_p2)
}
 0x292   : > { %s1709_s24 = scalar_lea.hbm %s2099_s12, 1664  ;;  %s1713_s9 = scalar_lea.hbm %s2151_s5, 3328 }
 0x293   : > { %p1710_p13 = scmp.ne.s32.totalorder %s2099_s12, %s1709_s24  ;;  %p1714_p4 = scmp.lt.u32.totalorder %s2099_s12, %s2151_s5 }
 0x294   : > { %p1715_p5 = scmp.lt.u32.totalorder %s1713_s9, %s1709_s24  ;;  %p1717_p11 = scmp.lt.u32.totalorder %s1709_s24, %s2099_s12 }
 0x295   : > { %p1711_p6 = pnand %p1710_p13, %p2165_p0 }
 0x296   : > { %p1716_p8 = por %p1715_p5, %p1714_p4 }
 0x297   : > { %p1712_p10 = pneg %p1711_p6 }
 0x298   : > { %p1718_p1 = por %p1717_p11, %p1716_p8 }
 0x29a   : > { %p1719_p3 = pnand %p1718_p1, %p1712_p10 }
 0x29c   : > { %1722 = shalt.err (!%p1719_p3)
}
 0x29d   : > { %s1777_s30 = smov 128   ;;  %s1778_s8 = smov 8  }
 0x29e   : > { %1464 = dma.vmem_to_hbm [thread:$0]  (%p2165_p0), %s2101_s7, 1664, %s2099_s12, %s1068_s13, %s1777_s30, %s1777_s30, %s1778_s8  }
 0x29f PF: > { %s1096_s10 = sand.u32 1, %s1753_s18   ;;  %p2166_p7 = scmp.ne.s32.totalorder %s2156_s25, 0 }
 0x2a0   : > { %p2167_p9 = scmp.ge.s32.totalorder %s1765_s21, 2  ;;  %s1097_s22 = scalar_lea.sflag [#allocation4], %s1096_s10 }
 0x2a2   : > { %p1478_p12 = pnand %p2167_p9, %p2166_p7 }
 0x2a4   : > { %1748 = dma.done.wait (!%p1478_p12), %s1097_s22, 1664  }
 0x2a5   : > { %1750 = vsyncadd (!%p1478_p12), %s1097_s22, 4294965632  ;;  %p19_p2 = scmp.ge.s32.totalorder %s1919_s14, 4   ;;  %s2168_s18 = smov %s1757_s19 }
 0x2a6   : > { %s2169_s19 = smov %s1761_s20  ;;  %s2170_s20 = smov %s1935_s27 }
 0x2a7   : > { %s2171_s21 = smov %s1919_s14  ;;  %21 = sbr.rel (!%p19_p2) target bundleno = 6 (0x6), region = 93 }
 0x2ae   :  { %1102 = vsyncpa [#allocation3], 1 }
 0x2af   :  { %1104 = vsyncpa [#allocation3 + $0x1], 1 }
 0x2b0   :  { %1105 = vsyncpa [#allocation6], 1 }
 0x2b1   :  { %1106 = vsyncpa [#allocation4], 1 }
 0x2b2   :  { %1108 = vsyncpa [#allocation4 + $0x1], 1 }

</bundles_post_ra>
